<compile_context>
chip_gen: v7x
topology: tpu7x:2x2x1
jax: 0.10.0
libtpu: 0.0.40
codegen_flags: <defaults>
</compile_context>

<pallas_src>
import functools

import jax
import jax.numpy as jnp
from jax import lax
from jax.experimental import pallas as pl
from jax.experimental.pallas import tpu as pltpu


# Scoped-VMEM budget: above the v5e/v6e defaults (16/32 MiB), below v7x's
# 64 MiB physical VMEM.  (v5e/v6e can be raised further for even larger tiles.)
_VMEM_LIMIT_BYTES = 48 * 1024 * 1024


# ----------------------------------------------------------------------------
# One-time parameter setup (per module, NOT per forward call).
# ----------------------------------------------------------------------------
def prepare_attention_params(w_qkv, w_out, *, d_qkv, n_heads):
    """w_qkv: (3*n_heads*d_qkv, d_model) torch nn.Linear layout with feature
    order (head, dq, plane) -- matches `.view(b, s, h, d, 3).unbind(-1)`.

    Returns a dict with:
      w_q, w_k, w_v      : (n_heads*d_qkv, d_model) head-major weights;
                           1/sqrt(d_qkv) is folded into w_q here (free).
      w_qkv_stacked      : (3*n_heads*d_qkv, d_model) = [w_q; w_k; w_v]
                           for the single fused QKV projection (tiled path).
      w_out              : (d_model, n_heads*d_qkv) output projection weight.
    """
    d_model = w_qkv.shape[1]
    w5 = w_qkv.reshape(n_heads, d_qkv, 3, d_model)
    inv_scale = 1.0 / (d_qkv ** 0.5)
    w_q = (w5[:, :, 0, :] * inv_scale).reshape(n_heads * d_qkv, d_model)
    w_q = w_q.astype(w_qkv.dtype)
    w_k = w5[:, :, 1, :].reshape(n_heads * d_qkv, d_model)
    w_v = w5[:, :, 2, :].reshape(n_heads * d_qkv, d_model)
    w_qkv_stacked = jnp.concatenate([w_q, w_k, w_v], axis=0)
    return dict(w_q=w_q, w_k=w_k, w_v=w_v,
                w_qkv_stacked=w_qkv_stacked, w_out=w_out)


# ----------------------------------------------------------------------------
# Tile-size helper: largest legal divisor <= target (never a silent full-extent
# multi-MiB block at non-divisible shapes; full extent only when dim <= target
# or no aligned divisor exists, which is always a legal block shape).
# ----------------------------------------------------------------------------
def _pick_tile(dim, target, multiple):
    if dim <= target:
        return dim
    upper = (min(target, dim) // multiple) * multiple
    for cand in range(upper, 0, -multiple):
        if dim % cand == 0:
            return cand
    return dim


# ----------------------------------------------------------------------------
# Tiled linear kernel:  y = x @ W.T  with W in (out, in) layout (no transpose).
# ----------------------------------------------------------------------------
def _linear_kernel(x_ref, w_ref, o_ref, acc_ref):
    # x block: (tm, tk); w block: (tn, tk). Contract dim 1 with dim 1.
    @pl.when(pl.program_id(2) == 0)
    def _():
        acc_ref[...] = jnp.zeros_like(acc_ref)

    acc_ref[...] += lax.dot_general(
        x_ref[...], w_ref[...],
        dimension_numbers=(((1,), (1,)), ((), ())),
        preferred_element_type=jnp.float32)

    @pl.when(pl.program_id(2) == pl.num_programs(2) - 1)
    def _():
        o_ref[...] = acc_ref[...].astype(o_ref.dtype)


def pallas_linear(x2d, weight, *, tm=512, tn=512, tk=1024):
    """x2d: (M, K); weight: (N, K) torch layout.  Returns (M, N) = x2d @ weight.T."""
    M, K = x2d.shape
    N, K2 = weight.shape
    assert K == K2, "in-feature mismatch"
    # tm: sublane dim of x/out blocks (multiple of 8); tn: lane dim of the out
    # block (multiple of 128); tk: lane dim of the x/w blocks (multiple of 128).
    tm = _pick_tile(M, tm, 8)
    tn = _pick_tile(N, tn, 128)
    tk = _pick_tile(K, tk, 128)
    grid = (M // tm, N // tn, K // tk)
    return pl.pallas_call(
        _linear_kernel,
        out_shape=jax.ShapeDtypeStruct((M, N), x2d.dtype),
        grid=grid,
        in_specs=[
            pl.BlockSpec((tm, tk), lambda i, j, k: (i, k)),
            pl.BlockSpec((tn, tk), lambda i, j, k: (j, k)),
        ],
        out_specs=pl.BlockSpec((tm, tn), lambda i, j, k: (i, j)),
        scratch_shapes=[pltpu.VMEM((tm, tn), jnp.float32)],
        compiler_params=pltpu.CompilerParams(
            dimension_semantics=("parallel", "parallel", "arbitrary"),
            vmem_limit_bytes=_VMEM_LIMIT_BYTES),
    )(x2d, weight)


# ----------------------------------------------------------------------------
# Shared attention math: all heads, head-batched (no per-head Python loop).
# ----------------------------------------------------------------------------
def _attend_all_heads(q, k, v, *, n_heads, d_qkv):
    """q: (tq, h*d), k/v: (s, h*d); scale already folded into q's weight.
    Returns the merged per-head context (tq, h*d) in f32.  Matmul operands
    keep the input dtype (bf16 MXU for bf16 models); accumulation is f32."""
    tq = q.shape[0]
    s = k.shape[0]
    # Single relayout per operand to head-leading layout instead of n_heads
    # narrow lane slices + a concatenate.
    qh = jnp.transpose(q.reshape(tq, n_heads, d_qkv), (1, 0, 2))   # (h, tq, d)
    kh = jnp.transpose(k.reshape(s, n_heads, d_qkv), (1, 0, 2))    # (h, s, d)
    vh = jnp.transpose(v.reshape(s, n_heads, d_qkv), (1, 0, 2))    # (h, s, d)

    scores = jnp.einsum("hqd,hkd->hqk", qh, kh,
                        preferred_element_type=jnp.float32)        # (h, tq, s) f32
    m = jnp.max(scores, axis=-1, keepdims=True)
    p = jnp.exp(scores - m)                                        # f32, EUP
    l = jnp.sum(p, axis=-1, keepdims=True)                         # (h, tq, 1)

    ctx = jnp.einsum("hqk,hkd->hqd", p.astype(vh.dtype), vh,
                     preferred_element_type=jnp.float32)           # (h, tq, d) f32
    # Deferred softmax normalization: O(h*tq*d) multiply after the matmul
    # instead of O(h*tq*s) on p; reciprocal on the EUP slot.
    ctx = ctx * pl.reciprocal(l, approx=True)

    merged = jnp.transpose(ctx, (1, 0, 2)).reshape(tq, n_heads * d_qkv)
    return merged                                                   # (tq, h*d) f32


# ----------------------------------------------------------------------------
# Attention kernel for the tiled path: one (batch, q-tile) per grid step,
# consuming the packed (s, 3*h*d) QKV slab (q/k/v sliced in VMEM).
# ----------------------------------------------------------------------------
def _mha_kernel(qkv_ref, o_ref, *, n_heads, d_qkv, tq):
    hd = n_heads * d_qkv
    j = pl.program_id(1)
    row0 = pl.multiple_of(j * tq, tq)
    q_rows = qkv_ref[0, pl.ds(row0, tq), :]           # (tq, 3*hd)
    q = q_rows[:, :hd]
    full = qkv_ref[0]                                 # (s, 3*hd)
    k = full[:, hd:2 * hd]
    v = full[:, 2 * hd:]
    merged = _attend_all_heads(q, k, v, n_heads=n_heads, d_qkv=d_qkv)
    o_ref[0] = merged.astype(o_ref.dtype)             # lane-dense store


def pallas_mha(qkv, *, n_heads, d_qkv, out_dtype, tq=256):
    """qkv: (b, s, 3*h*d) packed head-major [q|k|v] slabs -> context (b, s, h*d)."""
    b, s, hd3 = qkv.shape
    hd = n_heads * d_qkv
    assert hd3 == 3 * hd
    tq = _pick_tile(s, tq, 8)
    nq = s // tq
    return pl.pallas_call(
        functools.partial(_mha_kernel, n_heads=n_heads, d_qkv=d_qkv, tq=tq),
        out_shape=jax.ShapeDtypeStruct((b, s, hd), out_dtype),
        grid=(b, nq),
        # Packed QKV stays resident across the q-tile axis (constant index).
        in_specs=[pl.BlockSpec((1, s, 3 * hd), lambda i, j: (i, 0, 0))],
        out_specs=pl.BlockSpec((1, tq, hd), lambda i, j: (i, j, 0)),
        compiler_params=pltpu.CompilerParams(
            dimension_semantics=("parallel", "arbitrary"),
            vmem_limit_bytes=_VMEM_LIMIT_BYTES),
    )(qkv)


# ----------------------------------------------------------------------------
# Fully fused kernel: projections + attention + output projection.
# Grid = (batch, q-tiles); K/V projected once per batch into VMEM scratch.
# ----------------------------------------------------------------------------
def _fused_attention_kernel(x_ref, wq_ref, wk_ref, wv_ref, wo_ref, o_ref,
                            k_sc, v_sc, *, n_heads, d_qkv, tq):
    in_dtype = x_ref.dtype
    j = pl.program_id(1)

    def proj(x, w_ref):                               # x @ w.T, f32 accumulate
        return lax.dot_general(
            x, w_ref[...], dimension_numbers=(((1,), (1,)), ((), ())),
            preferred_element_type=jnp.float32)

    # Project K/V once per batch (first q-tile); keep resident in scratch in
    # the input dtype so downstream matmuls run at bf16 MXU rate for bf16 X.
    @pl.when(j == 0)
    def _():
        x_full = x_ref[0]                             # (s, d_model)
        k_sc[...] = proj(x_full, wk_ref).astype(k_sc.dtype)
        v_sc[...] = proj(x_full, wv_ref).astype(v_sc.dtype)

    row0 = pl.multiple_of(j * tq, tq)
    xq = x_ref[0, pl.ds(row0, tq), :]                 # (tq, d_model)
    # 1/sqrt(d_qkv) is already folded into wq (parameter setup time).
    q = proj(xq, wq_ref).astype(in_dtype)             # (tq, h*d)

    merged = _attend_all_heads(q, k_sc[...], v_sc[...],
                               n_heads=n_heads, d_qkv=d_qkv)      # (tq, h*d) f32

    out = lax.dot_general(                            # merged @ w_out.T
        merged.astype(wo_ref.dtype), wo_ref[...],
        dimension_numbers=(((1,), (1,)), ((), ())),
        preferred_element_type=jnp.float32)
    o_ref[0] = out.astype(o_ref.dtype)


def attention_forward_fused(X, params, *, d_qkv, n_heads, tq=256):
    """Single pallas_call over grid=(batch, s//tq); weights stay resident in
    VMEM (constant index_map), K/V live in scratch, no intermediate hits HBM."""
    b, s, d_model = X.shape
    hd = n_heads * d_qkv
    tq = _pick_tile(s, tq, 8)
    nq = s // tq
    x_spec = pl.BlockSpec((1, s, d_model), lambda i, j: (i, 0, 0))
    o_spec = pl.BlockSpec((1, tq, d_model), lambda i, j: (i, j, 0))
    wqkv_spec = pl.BlockSpec((hd, d_model), lambda i, j: (0, 0))
    wo_spec = pl.BlockSpec((d_model, hd), lambda i, j: (0, 0))
    return pl.pallas_call(
        functools.partial(_fused_attention_kernel,
                          n_heads=n_heads, d_qkv=d_qkv, tq=tq),
        out_shape=jax.ShapeDtypeStruct((b, s, d_model), X.dtype),
        grid=(b, nq),
        in_specs=[x_spec, wqkv_spec, wqkv_spec, wqkv_spec, wo_spec],
        out_specs=o_spec,
        scratch_shapes=[pltpu.VMEM((s, hd), X.dtype),    # K (per-batch resident)
                        pltpu.VMEM((s, hd), X.dtype)],   # V
        compiler_params=pltpu.CompilerParams(
            dimension_semantics=("parallel", "arbitrary"),
            vmem_limit_bytes=_VMEM_LIMIT_BYTES),
    )(X, params["w_q"], params["w_k"], params["w_v"], params["w_out"])


# ----------------------------------------------------------------------------
# General (tiled) forward: fused-QKV Pallas matmul + attention + out proj.
# ----------------------------------------------------------------------------
def attention_forward_tiled(X, params, *, d_qkv, n_heads):
    b, s, d_model = X.shape
    hd = n_heads * d_qkv
    x2d = X.reshape(b * s, d_model)
    # One projection pass: X is read from HBM once for q, k and v together.
    qkv = pallas_linear(x2d, params["w_qkv_stacked"]).reshape(b, s, 3 * hd)
    attn = pallas_mha(qkv, n_heads=n_heads, d_qkv=d_qkv, out_dtype=X.dtype)
    out = pallas_linear(attn.reshape(b * s, hd), params["w_out"])
    return out.reshape(b, s, d_model)


# ----------------------------------------------------------------------------
# Pure-JAX reference (mirror of the PyTorch forward, original weight layout).
# ----------------------------------------------------------------------------
def attention_reference(X, w_qkv, w_out, *, d_qkv, n_heads):
    b, s, d_model = X.shape
    scale = d_qkv ** 0.5
    qkv = X @ w_qkv.T
    qkv = qkv.reshape(b, s, n_heads, d_qkv, 3)
    q = jnp.transpose(qkv[..., 0], (0, 2, 1, 3))
    k = jnp.transpose(qkv[..., 1], (0, 2, 1, 3))
    v = jnp.transpose(qkv[..., 2], (0, 2, 1, 3))
    scores = jnp.einsum("bhqd,bhkd->bhqk", q, k) / scale
    w = jax.nn.softmax(scores, axis=-1)
    attn_out = jnp.einsum("bhqk,bhkd->bhqd", w, v)
    merged = jnp.transpose(attn_out, (0, 2, 1, 3)).reshape(b, s, n_heads * d_qkv)
    return merged @ w_out.T


if __name__ == "__main__":
    # Small shapes consistent with the module.
    batch, seq = 2, 8
    d_model, d_qkv, n_heads = 32, 8, 4

    key = jax.random.PRNGKey(0)
    kx, kq, ko = jax.random.split(key, 3)

    X = jax.random.normal(kx, (batch, seq, d_model), dtype=jnp.float32)
    # nn.Linear weights are (out_features, in_features), bias=False.
    w_qkv = jax.random.normal(kq, (3 * d_qkv * n_heads, d_model), jnp.float32) * 0.05
    w_out = jax.random.normal(ko, (d_model, d_qkv * n_heads), jnp.float32) * 0.05

    # One-time parameter setup (split interleaved QKV weight, fold 1/sqrt(d)).
    params = prepare_attention_params(w_qkv, w_out, d_qkv=d_qkv, n_heads=n_heads)

    ref = attention_reference(X, w_qkv, w_out, d_qkv=d_qkv, n_heads=n_heads)

    out_fused = attention_forward_fused(X, params, d_qkv=d_qkv, n_heads=n_heads)
    out_fused = jax.block_until_ready(out_fused)
    assert out_fused.shape == (batch, seq, d_model)
    assert jnp.allclose(out_fused, ref, atol=2e-3, rtol=2e-3), "fused mismatch"

    out_tiled = attention_forward_tiled(X, params, d_qkv=d_qkv, n_heads=n_heads)
    out_tiled = jax.block_until_ready(out_tiled)
    assert out_tiled.shape == (batch, seq, d_model)
    assert jnp.allclose(out_tiled, ref, atol=2e-3, rtol=2e-3), "tiled mismatch"

    print("KERNEL_OK")
</pallas_src>

<mosaic_0001>
module attributes {stable_mosaic.version = 11 : i64} {
  func.func @_fused_attention_kernel(%arg0: i32, %arg1: i32, %arg2: memref<1x8x32xf32, #tpu.memory_space<vmem>>, %arg3: memref<32x32xf32, #tpu.memory_space<vmem>>, %arg4: memref<32x32xf32, #tpu.memory_space<vmem>>, %arg5: memref<32x32xf32, #tpu.memory_space<vmem>>, %arg6: memref<32x32xf32, #tpu.memory_space<vmem>>, %arg7: memref<1x8x32xf32, #tpu.memory_space<vmem>>, %arg8: memref<8x32xf32, #tpu.memory_space<vmem>>, %arg9: memref<8x32xf32, #tpu.memory_space<vmem>>) attributes {dimension_semantics = [#tpu.dimension_semantics<parallel>, #tpu.dimension_semantics<arbitrary>], iteration_bounds = array<i64: 2, 1>, scalar_prefetch = 0 : i64, scratch_operands = 2 : i64, tpu.core_type = #tpu.core_type<tc>, window_params = [{transform_indices = @transform_0, window_bounds = array<i64: 1, 8, 32>}, {pipeline_mode = #tpu.pipeline_mode<synchronous>, transform_indices = @transform_1, window_bounds = array<i64: 32, 32>}, {pipeline_mode = #tpu.pipeline_mode<synchronous>, transform_indices = @transform_2, window_bounds = array<i64: 32, 32>}, {pipeline_mode = #tpu.pipeline_mode<synchronous>, transform_indices = @transform_3, window_bounds = array<i64: 32, 32>}, {pipeline_mode = #tpu.pipeline_mode<synchronous>, transform_indices = @transform_4, window_bounds = array<i64: 32, 32>}, {transform_indices = @transform_5, window_bounds = array<i64: 1, 8, 32>}]} {
    %c0_i32 = arith.constant 0 : i32
    %0 = arith.cmpi eq, %arg1, %c0_i32 : i32
    %1 = arith.extui %0 : i1 to i32
    %c0_i32_0 = arith.constant 0 : i32
    %2 = arith.cmpi ne, %1, %c0_i32_0 : i32
    scf.if %2 {
      %c0_18 = arith.constant 0 : index
      %c0_19 = arith.constant 0 : index
      %c0_20 = arith.constant 0 : index
      %37 = vector.load %arg2[%c0_18, %c0_19, %c0_20] : memref<1x8x32xf32, #tpu.memory_space<vmem>>, vector<1x8x32xf32>
      %38 = vector.shape_cast %37 : vector<1x8x32xf32> to vector<8x32xf32>
      %c0_21 = arith.constant 0 : index
      %c0_22 = arith.constant 0 : index
      %39 = vector.load %arg4[%c0_21, %c0_22] : memref<32x32xf32, #tpu.memory_space<vmem>>, vector<32x32xf32>
      %cst_23 = arith.constant dense<0.000000e+00> : vector<8x32xf32>
      %40 = tpu.matmul %38, %39, %cst_23 {dimension_numbers = #tpu.dot_dimension_numbers<[1], [1], [0], [0], [0, 0, 1, 0], [], []>} : vector<8x32xf32>, vector<32x32xf32>, vector<8x32xf32> -> vector<8x32xf32>
      %c0_24 = arith.constant 0 : index
      %c0_25 = arith.constant 0 : index
      %41 = vector.load %arg8[%c0_24, %c0_25] : memref<8x32xf32, #tpu.memory_space<vmem>>, vector<8x32xf32>
      tpu.vector_store %arg8[%c0_24, %c0_25], %40 {strides = array<i32>} : memref<8x32xf32, #tpu.memory_space<vmem>>, vector<8x32xf32>,
      %c0_26 = arith.constant 0 : index
      %c0_27 = arith.constant 0 : index
      %42 = vector.load %arg5[%c0_26, %c0_27] : memref<32x32xf32, #tpu.memory_space<vmem>>, vector<32x32xf32>
      %cst_28 = arith.constant dense<0.000000e+00> : vector<8x32xf32>
      %43 = tpu.matmul %38, %42, %cst_28 {dimension_numbers = #tpu.dot_dimension_numbers<[1], [1], [0], [0], [0, 0, 1, 0], [], []>} : vector<8x32xf32>, vector<32x32xf32>, vector<8x32xf32> -> vector<8x32xf32>
      %c0_29 = arith.constant 0 : index
      %c0_30 = arith.constant 0 : index
      %44 = vector.load %arg9[%c0_29, %c0_30] : memref<8x32xf32, #tpu.memory_space<vmem>>, vector<8x32xf32>
      tpu.vector_store %arg9[%c0_29, %c0_30], %43 {strides = array<i32>} : memref<8x32xf32, #tpu.memory_space<vmem>>, vector<8x32xf32>,
    } else {
    }
    %c8_i32 = arith.constant 8 : i32
    %3 = arith.muli %arg1, %c8_i32 : i32
    %4 = tpu.assume_multiple %3, 8 : i32
    %c0 = arith.constant 0 : index
    %5 = arith.index_cast %4 : i32 to index
    %c0_1 = arith.constant 0 : index
    %6 = vector.load %arg2[%c0, %5, %c0_1] : memref<1x8x32xf32, #tpu.memory_space<vmem>>, vector<1x8x32xf32>
    %7 = vector.shape_cast %6 : vector<1x8x32xf32> to vector<8x32xf32>
    %c0_2 = arith.constant 0 : index
    %c0_3 = arith.constant 0 : index
    %8 = vector.load %arg3[%c0_2, %c0_3] : memref<32x32xf32, #tpu.memory_space<vmem>>, vector<32x32xf32>
    %cst = arith.constant dense<0.000000e+00> : vector<8x32xf32>
    %9 = tpu.matmul %7, %8, %cst {dimension_numbers = #tpu.dot_dimension_numbers<[1], [1], [0], [0], [0, 0, 1, 0], [], []>} : vector<8x32xf32>, vector<32x32xf32>, vector<8x32xf32> -> vector<8x32xf32>
    %c0_4 = arith.constant 0 : index
    %c0_5 = arith.constant 0 : index
    %10 = vector.load %arg8[%c0_4, %c0_5] : memref<8x32xf32, #tpu.memory_space<vmem>>, vector<8x32xf32>
    %c0_6 = arith.constant 0 : index
    %c0_7 = arith.constant 0 : index
    %11 = vector.load %arg9[%c0_6, %c0_7] : memref<8x32xf32, #tpu.memory_space<vmem>>, vector<8x32xf32>
    %12 = vector.shape_cast %9 : vector<8x32xf32> to vector<8x4x8xf32>
    %13 = tpu.transpose %12, [1, 0, 2] : vector<8x4x8xf32> -> vector<4x8x8xf32>
    %14 = vector.shape_cast %10 : vector<8x32xf32> to vector<8x4x8xf32>
    %15 = tpu.transpose %14, [1, 0, 2] : vector<8x4x8xf32> -> vector<4x8x8xf32>
    %16 = vector.shape_cast %11 : vector<8x32xf32> to vector<8x4x8xf32>
    %17 = tpu.transpose %16, [1, 0, 2] : vector<8x4x8xf32> -> vector<4x8x8xf32>
    "tpu.trace_start"() <{level = 10 : i32, message = "hqd,hkd->hqk"}> : () -> ()
    %cst_8 = arith.constant dense<0.000000e+00> : vector<4x8x8xf32>
    %18 = tpu.matmul %13, %15, %cst_8 {dimension_numbers = #tpu.dot_dimension_numbers<[2], [2], [1], [1], [0, 0, 0, 1, 1, 1], [0], [0]>} : vector<4x8x8xf32>, vector<4x8x8xf32>, vector<4x8x8xf32> -> vector<4x8x8xf32>
    "tpu.trace_stop"() : () -> ()
    %cst_9 = arith.constant dense<0xFF800000> : vector<4x8xf32>
    %19 = vector.multi_reduction <maximumf>, %18, %cst_9 [2] : vector<4x8x8xf32> to vector<4x8xf32>
    %20 = vector.shape_cast %19 : vector<4x8xf32> to vector<4x8x1xf32>
    %21 = vector.broadcast %20 : vector<4x8x1xf32> to vector<4x8x8xf32>
    %22 = arith.subf %18, %21 : vector<4x8x8xf32>
    %23 = math.exp %22 : vector<4x8x8xf32>
    %cst_10 = arith.constant dense<0.000000e+00> : vector<4x8xf32>
    %24 = vector.multi_reduction <add>, %23, %cst_10 [2] : vector<4x8x8xf32> to vector<4x8xf32>
    %25 = vector.shape_cast %24 : vector<4x8xf32> to vector<4x8x1xf32>
    "tpu.trace_start"() <{level = 10 : i32, message = "hqk,hkd->hqd"}> : () -> ()
    %cst_11 = arith.constant dense<0.000000e+00> : vector<4x8x8xf32>
    %26 = tpu.matmul %23, %17, %cst_11 {dimension_numbers = #tpu.dot_dimension_numbers<[2], [1], [1], [2], [0, 0, 0, 1, 1, 2], [0], [0]>} : vector<4x8x8xf32>, vector<4x8x8xf32>, vector<4x8x8xf32> -> vector<4x8x8xf32>
    "tpu.trace_stop"() : () -> ()
    %27 = tpu.reciprocal %25 {approx = true} : vector<4x8x1xf32> -> vector<4x8x1xf32>
    %28 = vector.broadcast %27 : vector<4x8x1xf32> to vector<4x8x8xf32>
    %29 = arith.mulf %26, %28 : vector<4x8x8xf32>
    %30 = tpu.transpose %29, [1, 0, 2] : vector<4x8x8xf32> -> vector<8x4x8xf32>
    %31 = vector.shape_cast %30 : vector<8x4x8xf32> to vector<8x32xf32>
    %c0_12 = arith.constant 0 : index
    %c0_13 = arith.constant 0 : index
    %32 = vector.load %arg6[%c0_12, %c0_13] : memref<32x32xf32, #tpu.memory_space<vmem>>, vector<32x32xf32>
    %cst_14 = arith.constant dense<0.000000e+00> : vector<8x32xf32>
    %33 = tpu.matmul %31, %32, %cst_14 {dimension_numbers = #tpu.dot_dimension_numbers<[1], [1], [0], [0], [0, 0, 1, 0], [], []>} : vector<8x32xf32>, vector<32x32xf32>, vector<8x32xf32> -> vector<8x32xf32>
    %c0_15 = arith.constant 0 : index
    %c0_16 = arith.constant 0 : index
    %c0_17 = arith.constant 0 : index
    %34 = vector.load %arg7[%c0_15, %c0_16, %c0_17] : memref<1x8x32xf32, #tpu.memory_space<vmem>>, vector<1x8x32xf32>
    %35 = vector.shape_cast %34 : vector<1x8x32xf32> to vector<8x32xf32>
    %36 = vector.shape_cast %33 : vector<8x32xf32> to vector<1x8x32xf32>
    tpu.vector_store %arg7[%c0_15, %c0_16, %c0_17], %36 {strides = array<i32>} : memref<1x8x32xf32, #tpu.memory_space<vmem>>, vector<1x8x32xf32>,
    return
  }
  func.func @transform_0(%arg0: i32, %arg1: i32) -> (i32, i32, i32) {
    %c0_i32 = arith.constant 0 : i32
    %c0_i32_0 = arith.constant 0 : i32
    %c0_i32_1 = arith.constant 0 : i32
    return %arg0, %c0_i32, %c0_i32_0 : i32, i32, i32
  }
  func.func @transform_1(%arg0: i32, %arg1: i32) -> (i32, i32) {
    %c0_i32 = arith.constant 0 : i32
    %c0_i32_0 = arith.constant 0 : i32
    %c0_i32_1 = arith.constant 0 : i32
    return %c0_i32, %c0_i32_0 : i32, i32
  }
  func.func @transform_2(%arg0: i32, %arg1: i32) -> (i32, i32) {
    %c0_i32 = arith.constant 0 : i32
    %c0_i32_0 = arith.constant 0 : i32
    %c0_i32_1 = arith.constant 0 : i32
    return %c0_i32, %c0_i32_0 : i32, i32
  }
  func.func @transform_3(%arg0: i32, %arg1: i32) -> (i32, i32) {
    %c0_i32 = arith.constant 0 : i32
    %c0_i32_0 = arith.constant 0 : i32
    %c0_i32_1 = arith.constant 0 : i32
    return %c0_i32, %c0_i32_0 : i32, i32
  }
  func.func @transform_4(%arg0: i32, %arg1: i32) -> (i32, i32) {
    %c0_i32 = arith.constant 0 : i32
    %c0_i32_0 = arith.constant 0 : i32
    %c0_i32_1 = arith.constant 0 : i32
    return %c0_i32, %c0_i32_0 : i32, i32
  }
  func.func @transform_5(%arg0: i32, %arg1: i32) -> (i32, i32, i32) {
    %c0_i32 = arith.constant 0 : i32
    %c0_i32_0 = arith.constant 0 : i32
    return %arg0, %arg1, %c0_i32 : i32, i32, i32
  }
}

</mosaic_0001>

<bundles_post_ra>
// kernel: tpu_custom_call.1
= control target key start
LH: loop header
LB: loop body
LE: loop exit
PB: predicated region body
PF: predicated region fallthrough
CT: control target
= control target key end

     0   :  { %10 = vsyncpa [#allocation5], 0  ;;  %s3164_s0 = inlined_call_operand.hbm [shape: f32[2,8,32], index: 0, kind: input, shape index: {}]   ;;  %s3165_s1 = inlined_call_operand.hbm [shape: f32[32,32], index: 1, kind: input, shape index: {}]   ;;  %s3166_s2 = inlined_call_operand.hbm [shape: f32[32,32], index: 2, kind: input, shape index: {}]   ;;  %s3167_s3 = inlined_call_operand.hbm [shape: f32[32,32], index: 3, kind: input, shape index: {}]   ;;  %s3168_s4 = inlined_call_operand.hbm [shape: f32[32,32], index: 4, kind: input, shape index: {}]   ;;  %s3169_s5 = inlined_call_operand.hbm [shape: f32[2,8,32], index: 5, kind: output, shape index: {}]  }
   0x1   :  { %12 = vsyncpa [#allocation5 + $0x1], 0 }
   0x2   :  { %13 = vsyncpa [#allocation8], 0 }
   0x3   :  { %14 = vsyncpa [#allocation11], 0 }
   0x4   :  { %15 = vsyncpa [#allocation6], 0 }
   0x5   :  { %17 = vsyncpa [#allocation6 + $0x1], 0  ;;  %s2674_s18 = smov 0   ;;  %s2676_s19 = smov 0  }
   0x6   :  { %s2678_s20 = smov 0   ;;  %s2680_s21 = smov 0  }
   0x7   :  { %s2682_s22 = smov 0   ;;  %s2684_s23 = smov 0  }
   0x8 LB: > { %s2046_s24 = sadd.s32 4294967295, %s2623_s23   ;;  %p2048_p0 = scmp.ge.s32.totalorder %s2623_s23, 1  ;;  %s2623_s23 = sphi %s2684_s23, %s23_s23   ;;  %s2619_s22 = sphi %s2682_s22, %s3195_s22   ;;  %s2615_s21 = sphi %s2680_s21, %s3194_s21   ;;  %s2611_s20 = sphi %s2678_s20, %s3193_s20   ;;  %s2607_s19 = sphi %s2676_s19, %s3192_s19   ;;  %s2603_s18 = sphi %s2674_s18, %s3191_s18  }
   0x9   : > { %p2708_p1 = scmp.eq.s32.totalorder %s2046_s24, 0  ;;  %p178_p2 = scmp.lt.s32.totalorder %s2623_s23, 3 }
   0xa   : > { %s2625_s27 = smov [#allocation7]   ;;  %s2626_s30 = smov [#allocation10]  }
   0xb   : > { %s3174_s25 = scalar_select %p2708_p1, 1, 0 }
   0xc   : > { %p2713_p3 = pnand %p2048_p0, %p178_p2  ;;  %s190_s28 = sshll.u32 %s2625_s27, 4  ;;  %s2717_s28 = int_to_ptr.vmem [resolvable:$true] %s190_s28 }
   0xd   : > { %s216_s6 = sshll.u32 %s2626_s30, 4  ;;  %s2627_s7 = smov [#allocation9]   ;;  %s2728_s6 = int_to_ptr.vmem [resolvable:$true] %s216_s6 }
   0xe   : > { %s3175_s26 = scalar_select %p2713_p3, 1, 0 }
   0xf   : > { %p2279_p4 = pneg %p2713_p3  ;;  %s2730_s8 = sshll.u32 %s2627_s7, 4  ;;  %s204_s8 = int_to_ptr.vmem [resolvable:$true] %s2730_s8 }
  0x10   : > { %s2391_s11 = scalar_lea.hbm %s3165_s1, 512 }
  0x11   : > { %p2724_p6 = pnand %p2279_p4, %p2708_p1  ;;  %p2392_p7 = scmp.ne.s32.totalorder %s3165_s1, %s2391_s11 }
  0x12   : > { %p2398_p11 = scmp.lt.u32.totalorder %s2391_s11, %s3165_s1 }
  0x13   : > { %p2740_p8 = pneg %p2724_p6 }
  0x15   : > { %p2394_p9 = pnand %p2740_p8, %p2392_p7 }
  0x17   : > { %p2395_p10 = pneg %p2394_p9 }
  0x19   : > { %p2400_p12 = pnand %p2398_p11, %p2395_p10 }
  0x1b   : > { %2403 = shalt.err (!%p2400_p12)
}
  0x1c   : > { %s2404_s17 = scalar_lea.vmem %s2717_s28, 512  ;;  %p2412_p4 = scmp.lt.s32.totalorder %s2717_s28, %s2717_s28 }
  0x1d   : > { %p2405_p13 = scmp.ne.s32.totalorder %s2717_s28, %s2404_s17  ;;  %p2413_p5 = scmp.lt.s32.totalorder %s2404_s17, %s2404_s17 }
  0x1f   : > { %p2407_p0 = pnand %p2405_p13, %p2740_p8  ;;  %p2414_p7 = por %p2413_p5, %p2412_p4 }
  0x21   : > { %p2408_p2 = pneg %p2407_p0 }
  0x23   : > { %p2415_p9 = pnand %p2414_p7, %p2408_p2 }
  0x25   : > { %2418 = shalt.err (!%p2415_p9)
}
  0x26   : > { %s2628_s27 = smov 128   ;;  %s2629_s30 = smov 8  }
  0x27   : > { %2282 = dma.hbm_to_vmem [thread:$0]  (!%p2724_p6), %s3165_s1, 512, %s2717_s28, [#allocation8], %s2628_s27, %s2628_s27, %s2629_s30  }
  0x28   : > { %s2419_s12 = scalar_lea.hbm %s3167_s3, 512 }
  0x29   : > { %p2420_p5 = scmp.ne.s32.totalorder %s3167_s3, %s2419_s12  ;;  %p2426_p12 = scmp.lt.u32.totalorder %s2419_s12, %s3167_s3 }
  0x2b   : > { %p2422_p10 = pnand %p2420_p5, %p2740_p8 }
  0x2d   : > { %p2423_p11 = pneg %p2422_p10 }
  0x2f   : > { %p2428_p13 = pnand %p2426_p12, %p2423_p11 }
  0x31   : > { %2431 = shalt.err (!%p2428_p13)
}
  0x32   : > { %s2432_s28 = scalar_lea.vmem %s2728_s6, 512  ;;  %p2440_p7 = scmp.lt.s32.totalorder %s2728_s6, %s2728_s6 }
  0x33   : > { %p2433_p0 = scmp.ne.s32.totalorder %s2728_s6, %s2432_s28  ;;  %p2441_p9 = scmp.lt.s32.totalorder %s2432_s28, %s2432_s28 }
  0x35   : > { %p2435_p2 = pnand %p2433_p0, %p2740_p8  ;;  %p2442_p5 = por %p2441_p9, %p2440_p7 }
  0x37   : > { %p2436_p4 = pneg %p2435_p2 }
  0x39   : > { %p2443_p10 = pnand %p2442_p5, %p2436_p4 }
  0x3b   : > { %2446 = shalt.err (!%p2443_p10)
}
  0x3c   : > { %2288 = dma.hbm_to_vmem [thread:$0]  (!%p2724_p6), %s3167_s3, 512, %s2728_s6, [#allocation11], %s2628_s27, %s2628_s27, %s2629_s30  }
  0x3d   : > { %s2447_s12 = scalar_lea.hbm %s3166_s2, 512 }
  0x3e   : > { %p2448_p11 = scmp.ne.s32.totalorder %s3166_s2, %s2447_s12  ;;  %p2454_p0 = scmp.lt.u32.totalorder %s2447_s12, %s3166_s2 }
  0x40   : > { %p2450_p12 = pnand %p2448_p11, %p2740_p8 }
  0x42   : > { %p2451_p13 = pneg %p2450_p12 }
  0x44   : > { %p2456_p2 = pnand %p2454_p0, %p2451_p13 }
  0x46   : > { %2459 = shalt.err (!%p2456_p2)
}
  0x47   : > { %s2460_s28 = scalar_lea.vmem %s204_s8, 512  ;;  %p2468_p5 = scmp.lt.s32.totalorder %s204_s8, %s204_s8 }
  0x48   : > { %p2461_p4 = scmp.ne.s32.totalorder %s204_s8, %s2460_s28  ;;  %p2469_p10 = scmp.lt.s32.totalorder %s2460_s28, %s2460_s28 }
  0x4a   : > { %p2463_p7 = pnand %p2461_p4, %p2740_p8  ;;  %p2470_p3 = por %p2469_p10, %p2468_p5 }
  0x4c   : > { %p2464_p9 = pneg %p2463_p7 }
  0x4e   : > { %p2471_p1 = pnand %p2470_p3, %p2464_p9 }
  0x50   : > { %2474 = shalt.err (!%p2471_p1)
}
  0x51   : > { %2285 = dma.hbm_to_vmem [thread:$0]  (!%p2724_p6), %s3166_s2, 512, %s204_s8, [#allocation8], %s2628_s27, %s2628_s27, %s2629_s30  }
  0x52   : > { %s2630_s9 = smov [#allocation12]   ;;  %s2475_s13 = scalar_lea.hbm %s3168_s4, 512 }
  0x53   : > { %s229_s10 = sshll.u32 %s2630_s9, 4  ;;  %p2476_p1 = scmp.ne.s32.totalorder %s3168_s4, %s2475_s13  ;;  %s230_s10 = int_to_ptr.vmem [resolvable:$true] %s229_s10 }
  0x54   : > { %p2482_p12 = scmp.lt.u32.totalorder %s2475_s13, %s3168_s4 }
  0x55   : > { %p2478_p3 = pnand %p2476_p1, %p2740_p8 }
  0x57   : > { %p2479_p11 = pneg %p2478_p3 }
  0x59   : > { %p2484_p13 = pnand %p2482_p12, %p2479_p11 }
  0x5b   : > { %2487 = shalt.err (!%p2484_p13)
}
  0x5c   : > { %s2488_s8 = scalar_lea.vmem %s230_s10, 512  ;;  %p2496_p7 = scmp.lt.s32.totalorder %s230_s10, %s230_s10 }
  0x5d   : > { %p2489_p0 = scmp.ne.s32.totalorder %s230_s10, %s2488_s8  ;;  %p2497_p9 = scmp.lt.s32.totalorder %s2488_s8, %s2488_s8 }
  0x5f   : > { %p2491_p2 = pnand %p2489_p0, %p2740_p8  ;;  %p2498_p5 = por %p2497_p9, %p2496_p7 }
  0x61   : > { %p2492_p4 = pneg %p2491_p2 }
  0x63   : > { %p2499_p10 = pnand %p2498_p5, %p2492_p4 }
  0x65   : > { %2502 = shalt.err (!%p2499_p10)
}
  0x66   : > { %2291 = dma.hbm_to_vmem [thread:$0]  (!%p2724_p6), %s3168_s4, 512, %s230_s10, [#allocation11], %s2628_s27, %s2628_s27, %s2629_s30  }
  0x67   : > { %s2047_s29 = sadd.s32 4294967294, %s2623_s23   ;;  %s35_s14 = sadd.s32 1, %s2619_s22 }
  0x68   : > { %p37_p8 = scmp.ge.s32.totalorder %s35_s14, 2  ;;  %s42_s9 = sadd.s32 1, %s2611_s20 }
  0x69   : > { %p49_p1 = scmp.ne.s32.totalorder %s2611_s20, %s2607_s19  ;;  %p50_p3 = scmp.eq.s32.totalorder %s2623_s23, 0 }
  0x6a   : > { %s3197_s14 = smov (%p37_p8, %s35_s14), 0  ;;  %p55_p12 = scmp.ne.s32.totalorder %s2607_s19, %s2603_s18 }
  0x6b   : > { %p2841_p11 = por %p50_p3, %p49_p1  ;;  %s39_s27 = ssub.s32 %s2619_s22, %s3197_s14 }
  0x6c   : > { %p165_p6 = scmp.eq.s32.totalorder %s2046_s24, 1  ;;  %p40_p13 = scmp.eq.s32.totalorder %s39_s27, 0 }
  0x6d   : > { %p3179_p0 = scmp.ne.s32.totalorder %s3174_s25, 0  ;;  %p171_p7 = scmp.eq.s32.totalorder %s2047_s29, 1 }
  0x6e   : > { %p2857_p4 = por %p165_p6, %p49_p1  ;;  %p2304_p5 = scmp.lt.s32.totalorder %s2623_s23, 2 }
  0x6f   : > { %p2853_p2 = por %p3179_p0, %p55_p12  ;;  %p2864_p9 = por %p171_p7, %p55_p12 }
  0x70   : > { %s3181_s10 = scalar_select %p2857_p4, 1, 0 }
  0x71   : > { %s2862_s12 = scalar_select %p40_p13, %s2611_s20, %s42_s9  }
  0x72   : > { %s3182_s13 = scalar_select %p2864_p9, 1, 0 }
  0x73   : > { %s243_s15 = sand.u32 1, %s2611_s20   ;;  %s2055_s24 = sshll.u32 %s2619_s22, 7 }
  0x74   : > { %s2054_s16 = sshll.u32 %s243_s15, 3  ;;  %s2874_s8 = scalar_lea.hbm %s3164_s0, %s2055_s24 }
  0x75   : > { %s247_s6 = scalar_lea.vmem [#allocation4], %s2054_s16  ;;  %p2878_p10 = pnand %p2304_p5, %p2841_p11 }
  0x76   : > { %s254_s7 = sshll.u32 %s247_s6, 4  ;;  %s244_s9 = scalar_lea.sflag [#allocation5], %s243_s15  ;;  %s2882_s7 = int_to_ptr.vmem [resolvable:$true] %s254_s7 }
  0x77   : > { %s2503_s27 = scalar_lea.hbm %s2874_s8, 128  ;;  %p2505_p1 = pneg %p2878_p10 }
  0x78   : > { %p2504_p8 = scmp.ne.s32.totalorder %s2874_s8, %s2503_s27  ;;  %s2508_s11 = scalar_lea.hbm %s3164_s0, 256 }
  0x79   : > { %p2509_p11 = scmp.lt.u32.totalorder %s2874_s8, %s3164_s0  ;;  %p2510_p6 = scmp.lt.u32.totalorder %s2508_s11, %s2503_s27 }
  0x7a   : > { %p2506_p3 = pnand %p2505_p1, %p2504_p8  ;;  %p2512_p0 = scmp.lt.u32.totalorder %s2503_s27, %s2874_s8 }
  0x7b   : > { %p2511_p13 = por %p2510_p6, %p2509_p11 }
  0x7c   : > { %p2507_p12 = pneg %p2506_p3 }
  0x7d   : > { %p2513_p7 = por %p2512_p0, %p2511_p13 }
  0x7f   : > { %p2514_p5 = pnand %p2513_p7, %p2507_p12 }
  0x81   : > { %2517 = shalt.err (!%p2514_p5)
}
  0x82   : > { %s2518_s15 = scalar_lea.vmem %s2882_s7, 128  ;;  %s2631_s6 = smov [#allocation4]  }
  0x83   : > { %p2519_p8 = scmp.ne.s32.totalorder %s2882_s7, %s2518_s15  ;;  %s2523_s24 = sshll.u32 %s2631_s6, 4  ;;  %s2524_s24 = int_to_ptr.vmem [resolvable:$false] %s2523_s24 }
  0x84   : > { %s2525_s16 = scalar_lea.vmem %s2524_s24, 256  ;;  %p2526_p4 = scmp.lt.s32.totalorder %s2882_s7, %s2524_s24 }
  0x85   : > { %p2521_p3 = pnand %p2519_p8, %p2505_p1  ;;  %p2527_p11 = scmp.lt.s32.totalorder %s2525_s16, %s2518_s15 }
  0x87   : > { %p2522_p9 = pneg %p2521_p3  ;;  %p2528_p6 = por %p2527_p11, %p2526_p4 }
  0x89   : > { %p2529_p13 = pnand %p2528_p6, %p2522_p9 }
  0x8b   : > { %2532 = shalt.err (!%p2529_p13)
}
  0x8c   : > { %2295 = dma.hbm_to_vmem [thread:$0]  (!%p2878_p10), %s2874_s8, 128, %s2882_s7, %s244_s9  }
  0x8d   : > { %p3184_p12 = scmp.ne.s32.totalorder %s3175_s26, 0 }
  0x8e   : > { %s2912_s27 = sand.u32 (!%p3184_p12), 1, %s2607_s19  }
  0x8f   : > { %263 = sbr.rel (%p3184_p12) target bundleno = 1546 (0x60a), region = 40  ;;  %s2057_s11 = sshll.u32 (!%p3184_p12), %s2912_s27, 3 }
  0x90   : > { %s266_s17 = scalar_lea.sflag (!%p3184_p12), [#allocation5], %s2912_s27  ;;  %s269_s28 = scalar_lea.vmem (!%p3184_p12), [#allocation4], %s2057_s11 }
  0x96   : > { %2586 = dma.done.wait (%p2853_p2), %s266_s17, 128  }
  0x97   : > { %2588 = vsyncadd (%p2853_p2), %s266_s17, 4294967168  ;;  %p3185_p4 = scmp.ne.s32.totalorder %s3174_s25, 0 }
  0x99   : > { %2590 = dma.done.wait (%p3185_p4), [#allocation8], 1024  }
  0x9a   : > { %2592 = vsyncadd (%p3185_p4), [#allocation8], 4294966272 }
  0x9b   : > { %2594 = dma.done.wait (%p3185_p4), [#allocation11], 1024  }
  0x9c   : > { %2596 = vsyncadd (%p3185_p4), [#allocation11], 4294966272  ;;  %v2632_v0 = vmov 0.0|0.0   ;;  %vm2633_vm0 = vmmov 0   ;;  %v2634_v1 = vmov 0.0   ;;  %vm321_vm1 = vcmask 261120  }
  0x9d   : > { %2227 = vmatprep.subr.bf16.mxu0 %v2632_v0  ;;  %2151 = vmatprep.mubr.msk.f32.mxu0 %vm2633_vm0, %v2634_v1  ;;  %v317_v2 = vld [vmem:[#allocation9] sm:$0xff]  ;;  %v318_v3 = vld [vmem:[#allocation9 + $0x8] sm:$0xff]  ;;  %vm2938_vm2 = vmpackc.low %vm321_vm1, %vm321_vm1  ;;  %s2635_s25 = smov 120   ;;  %s2636_s26 = smov 104   ;;  %v2638_v29 = vmov 1983009808   ;;  %v605_v31 = vlaneseq }
  0x9e   : > { %2235 = vmatprep.subr.bf16.mxu1 %v2632_v0  ;;  %2162 = vmatprep.mubr.msk.f32.mxu1 %vm2633_vm0, %v2634_v1  ;;  %v2228_v5 = vpack.c.bf16 %v318_v3, %v317_v2  ;;  %v319_v6 = vld [vmem:[#allocation9 + $0x10] sm:$0xff]  ;;  %v320_v7 = vld [vmem:[#allocation9 + $0x18] sm:$0xff]  ;;  %v498_v9 = vld [vmem:[#allocation7] sm:$0xff]  ;;  %s2637_s30 = smov 112   ;;  %v603_v30 = vunpack.c.l.s4 %v2638_v29  ;;  %v2639_v32 = vmov 1934713408  }
  0x9f   : > { %v2232_v8 = vpack.c.bf16 %v320_v7, %v319_v6  ;;  %v499_v10 = vld [vmem:[#allocation7 + $0x8] sm:$0xff]  ;;  %v316_v11 = vld [vmem:[%s269_s28] sm:$0xff]  ;;  %v408_v16 = vld [vmem:[#allocation10] sm:$0xff]  ;;  %v635_v33 = vunpack.c.l.s4 %v2639_v32  ;;  %v606_v35 = vshrl.u32 %v605_v31, 7  ;;  %vm1028_vm3 = vcmask 64512   ;;  %s2640_s8 = smov 16  }
  0xa0   : > { %2230 = vmatpush3.bf16.xpose.msk.msra.mxu0 %vm2938_vm2, %v2228_v5  ;;  %v2244_v12 = vpack.c.bf16 %v499_v10, %v498_v9  ;;  %v500_v13 = vld [vmem:[#allocation7 + $0x10] sm:$0xff]  ;;  %v501_v14 = vld [vmem:[#allocation7 + $0x18] sm:$0xff]  ;;  %v409_v17 = vld [vmem:[#allocation10 + $0x8] sm:$0xff]  ;;  %v604_v34 = vunpack.c.0.s8 %v603_v30  ;;  %s2641_s7 = smov 8   ;;  %s2642_s29 = smov 24   ;;  %vm1818_vm4 = vcmask 130048  }
  0xa1   : > { %2231 = vmatprep.subr.bf16.mxu0 %v2632_v0  ;;  %v2248_v15 = vpack.c.bf16 %v501_v14, %v500_v13  ;;  %v2236_v18 = vpack.c.bf16 %v409_v17, %v408_v16  ;;  %v410_v19 = vld [vmem:[#allocation10 + $0x10] sm:$0xff]  ;;  %v411_v20 = vld [vmem:[#allocation10 + $0x18] sm:$0xff]  ;;  %v636_v39 = vunpack.c.0.s8 %v635_v33  ;;  %vm1820_vm5 = vcmask 195584   ;;  %s2104_s9 = sshll.u32 %s2615_s21, 7  ;;  %s311_s15 = scalar_lea.vmem [#allocation13], %s2057_s11 }
  0xa2   : > { %v2240_v21 = vpack.c.bf16 %v411_v20, %v410_v19  ;;  %v2978_v40 = vsub.s32 %v604_v34, %v606_v35  ;;  %s1927_s6 = sshll.u32 %s311_s15, 4  ;;  %s3114_s17 = scalar_lea.hbm %s3169_s5, %s2104_s9  ;;  %s3116_s6 = int_to_ptr.vmem [resolvable:$true] %s1927_s6 }
  0xa3   : > { %2238 = vmatpush3.bf16.xpose.msk.msra.mxu1 %vm2938_vm2, %v2236_v18  ;;  %v2980_v46 = vsub.s32 %v636_v39, %v606_v35  ;;  %s1913_s28 = scalar_lea.sflag [#allocation6], %s2912_s27  ;;  %p3188_p9 = scmp.ne.s32.totalorder %s3181_s10, 0 }
  0xa4   : > { %2239 = vmatprep.subr.bf16.mxu1 %v2632_v0  ;;  %s2643_s21 = smov [#allocation13]  }
  0xa5   : > { %s2537_s11 = sshll.u32 %s2643_s21, 4  ;;  %s2538_s11 = int_to_ptr.vmem [resolvable:$false] %s2537_s11 }
  0xa6   : > { %p2540_p0 = scmp.lt.s32.totalorder %s3116_s6, %s2538_s11 }
  0xa8   : > { %2234 = vmatpush3.bf16.xpose.msk.msra.mxu0 %vm2938_vm2, %v2232_v8 }
  0xa9   : > { %2243 = vmatprep.subr.bf16.mxu0 %v2632_v0 }
  0xab   : > { %2242 = vmatpush3.bf16.xpose.msk.msra.mxu1 %vm2938_vm2, %v2240_v21 }
  0xac   : > { %2176 = vmatprep.subr.mxu1 %v2634_v1 }
  0xaf   : > { %2152 = vmatmul.mubr.msk.f32.vlgmr.msra.gmra.mrb[0].mxu0 %vm321_vm1, %v316_v11 }
  0xb0   : > { %2246 = vmatpush3.bf16.xpose.msk.msra.mxu0 %vm2938_vm2, %v2244_v12  ;;  %2173 = vmatprep.mubr.msk.f32.mxu0 %vm2633_vm0, %v2634_v1 }
  0xb1   : > { %2247 = vmatprep.subr.bf16.mxu0 %v2632_v0 }
  0xb2   : > { %2163 = vmatmul.mubr.msk.f32.vlgmr.msra.gmra.mrb[0].mxu1 %vm321_vm1, %v316_v11 }
  0xb3   : > { %2178 = vmatprep.mubr.msk.f32.mxu1 %vm2633_vm0, %v2634_v1 }
  0xb8   : > { %2250 = vmatpush3.bf16.xpose.msk.msra.mxu0 %vm2938_vm2, %v2248_v15 }
  0xb9   : > { %2251 = vmatprep.subr.bf16.mxu0 %v2632_v0 }
  0xbf   : > { %2174 = vmatmul.mubr.msk.f32.vlgmr.msra.gmra.mrb[2].mxu0 %vm321_vm1, %v316_v11 }
  0xc0   : > { %2224 = vmatprep.mubr.msk.f32.mxu0 %vm2633_vm0, %v2634_v1 }
 0x182   : > { %v403_v22 = vpop.f32.mrb[0].mxu0 }
 0x183   : > { %407 = vst.msk [vmem:[#allocation2] sm:$0xff] %vm321_vm1, %v403_v22  ;;  %v2153_v23 = vpop.f32.mrb[1].mxu0 }
 0x185   : > { %v490_v27 = vpop.f32.mrb[0].mxu1 }
 0x186   : > { %494 = vst.msk [vmem:[#allocation3] sm:$0xff] %vm321_vm1, %v490_v27  ;;  %v2164_v28 = vpop.f32.mrb[1].mxu1 }
 0x18a   : > { %v588_v24 = vld [vmem:[#allocation2] sm:$0xff] }
 0x18b   : > { %737 = vrot.lane.b32.xlu0 %v588_v24, %s2635_s25  ;;  %743 = vrot.lane.b32.xlu1 %v588_v24, %s2636_s26 }
 0x18d   : > { %v2975_v36 = vld [vmem:[#allocation3] sm:$0xff] }
 0x18f   : > { %740 = vrot.lane.b32.xlu0 %v588_v24, %s2637_s30 }
 0x192   : > { %v584_v25 = vpop.f32.mrb[2].mxu0 }
 0x193   : > { %594 = vrot.lane.b32.xlu0 %v584_v25, %s2637_s30  ;;  %591 = vrot.lane.b32.xlu1 %v584_v25, %s2635_s25  ;;  %v2175_v26 = vpop.f32.mrb[3].mxu0 }
 0x197   : > { %597 = vrot.lane.b32.xlu1 %v584_v25, %s2636_s26 }
 0x19b   : > { %886 = vrot.lane.b32.xlu1 %v2975_v36, %s2637_s30 }
 0x1fd   : > { %v738_v37 = vpop.permute.xlu0 %737  ;;  %v744_v38 = vpop.permute.xlu1 %743 }
 0x1fe   : > { %v762_v41 = vcombine.low %v738_v37, %v744_v38  ;;  %v763_v42 = vcombine.high %v738_v37, %v744_v38 }
 0x200   : > { %v770_v47 = vrot.slane %v762_v41, %v2978_v40  ;;  %v777_v48 = vrot.slane %v763_v42, %v2978_v40 }
 0x201   : > { %v741_v43 = vpop.permute.xlu0 %740 }
 0x202   : > { %v746_v44 = vcombine.low %v588_v24, %v741_v43  ;;  %v747_v45 = vcombine.high %v588_v24, %v741_v43 }
 0x204   : > { %v754_v49 = vrot.slane %v746_v44, %v2978_v40  ;;  %v761_v50 = vrot.slane %v747_v45, %v2978_v40 }
 0x205   : > { %v592_v51 = vpop.permute.xlu1 %591  ;;  %v595_v56 = vpop.permute.xlu0 %594 }
 0x206   : > { %v778_v52 = vcombine.low %v754_v49, %v770_v47  ;;  %v779_v53 = vcombine.high %v754_v49, %v770_v47  ;;  %v794_v54 = vcombine.low %v761_v50, %v777_v48  ;;  %v795_v55 = vcombine.high %v761_v50, %v777_v48 }
 0x207   : > { %v600_v61 = vcombine.low %v584_v25, %v595_v56  ;;  %v601_v62 = vcombine.high %v584_v25, %v595_v56 }
 0x208   : > { %v786_v57 = vrot.slane %v778_v52, %v2980_v46  ;;  %v793_v58 = vrot.slane %v779_v53, %v2980_v46  ;;  %v802_v59 = vrot.slane %v794_v54, %v2980_v46  ;;  %v809_v60 = vrot.slane %v795_v55, %v2980_v46 }
 0x209   : > { %v598_v63 = vpop.permute.xlu1 %597  ;;  %v608_v13 = vrot.slane %v600_v61, %v2978_v40  ;;  %v615_v14 = vrot.slane %v601_v62, %v2978_v40 }
 0x20a   : > { %v814_v2 = vcombine.low %v786_v57, %v793_v58  ;;  %v2080_v3 = vcombine.high %v786_v57, %v793_v58  ;;  %v830_v5 = vcombine.low %v802_v59, %v809_v60  ;;  %v2081_v6 = vcombine.high %v802_v59, %v809_v60 }
 0x20b   : > { %v616_v7 = vcombine.low %v592_v51, %v598_v63  ;;  %v617_v8 = vcombine.high %v592_v51, %v598_v63 }
 0x20c   : > { %v821_v9 = vrot.slane %v814_v2, %v2978_v40  ;;  %v829_v10 = vrot.slane %v2080_v3, %v2978_v40  ;;  %v837_v11 = vrot.slane %v830_v5, %v2978_v40  ;;  %v845_v12 = vrot.slane %v2081_v6, %v2978_v40 }
 0x20d   : > { %v624_v15 = vrot.slane %v616_v7, %v2978_v40  ;;  %v631_v16 = vrot.slane %v617_v8, %v2978_v40 }
 0x20e   : > { %v846_v17 = vcombine.low %v821_v9, %v829_v10  ;;  %v862_v18 = vcombine.low %v837_v11, %v845_v12  ;;  %v847_v42 = vcombine.high %v821_v9, %v829_v10  ;;  %v863_v43 = vcombine.high %v837_v11, %v845_v12  ;;  %v887_v11 = vpop.permute.xlu1 %886 }
 0x20f   : > { %v632_v19 = vcombine.low %v608_v13, %v624_v15  ;;  %v633_v20 = vcombine.high %v608_v13, %v624_v15  ;;  %v648_v21 = vcombine.low %v615_v14, %v631_v16  ;;  %v649_v22 = vcombine.high %v615_v14, %v631_v16 }
 0x210   : > { %v854_v23 = vrot.slane %v846_v17, %v2980_v46  ;;  %v870_v24 = vrot.slane %v862_v18, %v2980_v46  ;;  %v861_v51 = vrot.slane %v847_v42, %v2980_v46  ;;  %v877_v52 = vrot.slane %v863_v43, %v2980_v46 }
 0x211   : > { %v640_v25 = vrot.slane %v632_v19, %v2980_v46  ;;  %v647_v26 = vrot.slane %v633_v20, %v2980_v46  ;;  %v656_v27 = vrot.slane %v648_v21, %v2980_v46  ;;  %v663_v28 = vrot.slane %v649_v22, %v2980_v46 }
 0x212   : > { %v878_v29 = vcombine.low %v854_v23, %v870_v24  ;;  %v879_v50 = vcombine.high %v854_v23, %v870_v24  ;;  %v880_v56 = vcombine.low %v861_v51, %v877_v52  ;;  %v881_v58 = vcombine.high %v861_v51, %v877_v52 }
 0x213   : > { %v668_v30 = vcombine.low %v640_v25, %v647_v26  ;;  %v2078_v31 = vcombine.high %v640_v25, %v647_v26  ;;  %v684_v32 = vcombine.low %v656_v27, %v663_v28  ;;  %v2079_v33 = vcombine.high %v656_v27, %v663_v28 }
 0x214   : > { %2177 = vmatpush3.xpose.msk.msra.mxu1 %vm1028_vm3, %v878_v29  ;;  %v892_v17 = vcombine.low %v2975_v36, %v887_v11  ;;  %v893_v18 = vcombine.high %v2975_v36, %v887_v11 }
 0x215   : > { %v675_v34 = vrot.slane %v668_v30, %v2978_v40  ;;  %v683_v35 = vrot.slane %v2078_v31, %v2978_v40  ;;  %v691_v37 = vrot.slane %v684_v32, %v2978_v40  ;;  %v699_v38 = vrot.slane %v2079_v33, %v2978_v40  ;;  %2181 = vmatprep.subr.mxu1 %v2634_v1 }
 0x216   : > { %v900_v24 = vrot.slane %v892_v17, %v2978_v40  ;;  %v907_v25 = vrot.slane %v893_v18, %v2978_v40 }
 0x217   : > { %v700_v39 = vcombine.low %v675_v34, %v683_v35  ;;  %v716_v41 = vcombine.low %v691_v37, %v699_v38  ;;  %v701_v47 = vcombine.high %v675_v34, %v683_v35  ;;  %v717_v48 = vcombine.high %v691_v37, %v699_v38 }
 0x219   : > { %v708_v44 = vrot.slane %v700_v39, %v2980_v46  ;;  %v724_v45 = vrot.slane %v716_v41, %v2980_v46  ;;  %v715_v54 = vrot.slane %v701_v47, %v2980_v46  ;;  %v731_v55 = vrot.slane %v717_v48, %v2980_v46 }
 0x21b   : > { %v732_v49 = vcombine.low %v708_v44, %v724_v45  ;;  %v733_v53 = vcombine.high %v708_v44, %v724_v45  ;;  %v734_v57 = vcombine.low %v715_v54, %v731_v55  ;;  %v735_v59 = vcombine.high %v715_v54, %v731_v55 }
 0x21d   : > { %2179 = vmatmul.mubr.msk.f32.vlgmr.msra.gmra.mrb[2].mxu1 %vm1028_vm3, %v732_v49 }
 0x21e   : > { %2182 = vmatpush3.xpose.msk.msra.mxu1 %vm1028_vm3, %v879_v50  ;;  %2183 = vmatprep.mubr.msk.f32.mxu1 %vm2633_vm0, %v2634_v1 }
 0x21f   : > { %2186 = vmatprep.subr.mxu1 %v2634_v1 }
 0x221   : > { %2184 = vmatmul.mubr.msk.f32.vlgmr.msra.gmra.mrb[4].mxu1 %vm1028_vm3, %v733_v53 }
 0x222   : > { %2187 = vmatpush3.xpose.msk.msra.mxu1 %vm1028_vm3, %v880_v56  ;;  %2188 = vmatprep.mubr.msk.f32.mxu1 %vm2633_vm0, %v2634_v1 }
 0x223   : > { %2191 = vmatprep.subr.mxu1 %v2634_v1 }
 0x225   : > { %2189 = vmatmul.mubr.msk.f32.vlgmr.msra.gmra.mrb[6].mxu1 %vm1028_vm3, %v734_v57 }
 0x226   : > { %2192 = vmatpush3.xpose.msk.msra.mxu1 %vm1028_vm3, %v881_v58  ;;  %2193 = vmatprep.mubr.msk.f32.mxu1 %vm2633_vm0, %v2634_v1 }
 0x227   : > { %2196 = vmatprep.subr.mxu1 %v2634_v1 }
 0x229   : > { %2194 = vmatmul.mubr.msk.f32.vlgmr.msra.gmra.mrb[8].mxu1 %vm1028_vm3, %v735_v59 }
 0x22a   : > { %2198 = vmatprep.mubr.msk.f32.mxu1 %vm2633_vm0, %v2634_v1 }
 0x2f0   : > { %v1101_v60 = vpop.f32.mrb[2].mxu1 }
 0x2f1   : > { %v2180_v61 = vpop.f32.mrb[3].mxu1  ;;  %v1333_v62 = vsel %vm1028_vm3, %v1101_v60, -inf }
 0x2f2   : > { %1334 = vmax.xlane.f32.xlu0 %v1333_v62 }
 0x2f4   : > { %v1177_v63 = vpop.f32.mrb[4].mxu1 }
 0x2f5   : > { %v2185_v2 = vpop.f32.mrb[5].mxu1  ;;  %v1336_v3 = vsel %vm1028_vm3, %v1177_v63, -inf }
 0x2f6   : > { %1337 = vmax.xlane.f32.xlu1 %v1336_v3 }
 0x2f8   : > { %v3036_v5 = vpop.f32.mrb[6].mxu1 }
 0x2f9   : > { %v2190_v6 = vpop.f32.mrb[7].mxu1  ;;  %v1339_v9 = vsel %vm1028_vm3, %v3036_v5, -inf }
 0x2fc   : > { %v3038_v7 = vpop.f32.mrb[8].mxu1 }
 0x2fd   : > { %v2195_v8 = vpop.f32.mrb[9].mxu1  ;;  %v1342_v10 = vsel %vm1028_vm3, %v3038_v7, -inf }
 0x307   : > { %889 = vrot.lane.b32.xlu1 %v2975_v36, %s2636_s26  ;;  %s2539_s26 = scalar_lea.vmem %s2538_s11, 256 }
 0x308   : > { %883 = vrot.lane.b32.xlu0 %v2975_v36, %s2635_s25  ;;  %s2533_s25 = scalar_lea.vmem %s3116_s6, 128 }
 0x309   : > { %p2534_p2 = scmp.ne.s32.totalorder %s3116_s6, %s2533_s25  ;;  %p2541_p7 = scmp.lt.s32.totalorder %s2539_s26, %s2533_s25 }
 0x30b   : > { %p2535_p10 = pnand %p2534_p2, %p3188_p9  ;;  %p2542_p5 = por %p2541_p7, %p2540_p0 }
 0x30d   : > { %p2536_p1 = pneg %p2535_p10 }
 0x30f   : > { %p2543_p8 = pnand %p2542_p5, %p2536_p1 }
 0x327   : > { %1340 = vmax.xlane.f32.xlu0 %v1339_v9 }
 0x32b   : > { %1343 = vmax.xlane.f32.xlu0 %v1342_v10 }
 0x37f   : > { %v1335_v12 = vpop.xlane.xlu0 %1334 }
 0x380   : > { %v1345_v13 = vsub.f32 %v1101_v60, %v1335_v12  ;;  %v1823_v12 = vld [vmem:[#allocation12 + $0x8] sm:$0xff] }
 0x382   : > { %v1349_v14 = vmul.f32 1.442695, %v1345_v13 }
 0x383   : > { %v1338_v15 = vpop.xlane.xlu1 %1337  ;;  %v884_v20 = vpop.permute.xlu0 %883 }
 0x384   : > { %2375 = vpow2.f32 %v1349_v14  ;;  %v1346_v16 = vsub.f32 %v1177_v63, %v1338_v15  ;;  %v1824_v14 = vld [vmem:[#allocation12 + $0x10] sm:$0xff]  ;;  %v1825_v15 = vld [vmem:[#allocation12 + $0x18] sm:$0xff] }
 0x386   : > { %v1351_v19 = vmul.f32 1.442695, %v1346_v16  ;;  %v2256_v16 = vpack.c.bf16 %v1825_v15, %v1824_v14 }
 0x387   : > { %v890_v21 = vpop.permute.xlu1 %889 }
 0x388   : > { %2377 = vpow2.f32 %v1351_v19  ;;  %v908_v22 = vcombine.low %v884_v20, %v890_v21  ;;  %v909_v23 = vcombine.high %v884_v20, %v890_v21 }
 0x38a   : > { %v916_v26 = vrot.slane %v908_v22, %v2978_v40  ;;  %v923_v27 = vrot.slane %v909_v23, %v2978_v40 }
 0x38c   : > { %v924_v28 = vcombine.low %v900_v24, %v916_v26  ;;  %v925_v29 = vcombine.high %v900_v24, %v916_v26  ;;  %v940_v30 = vcombine.low %v907_v25, %v923_v27  ;;  %v941_v31 = vcombine.high %v907_v25, %v923_v27 }
 0x38e   : > { %v2376_v32 = vpop.eup %2375  ;;  %v932_v36 = vrot.slane %v924_v28, %v2980_v46  ;;  %v939_v33 = vrot.slane %v925_v29, %v2980_v46  ;;  %v948_v34 = vrot.slane %v940_v30, %v2980_v46  ;;  %v955_v35 = vrot.slane %v941_v31, %v2980_v46 }
 0x38f   : > { %v1357_v37 = vsel %vm1028_vm3, %v2376_v32, 0.0 }
 0x390   : > { %v960_v38 = vcombine.low %v932_v36, %v939_v33  ;;  %v2082_v39 = vcombine.high %v932_v36, %v939_v33  ;;  %v976_v41 = vcombine.low %v948_v34, %v955_v35  ;;  %v2083_v42 = vcombine.high %v948_v34, %v955_v35  ;;  %1358 = vadd.xlane.f32.xlu1 %v1357_v37 }
 0x392   : > { %v2378_v43 = vpop.eup %2377  ;;  %v967_v44 = vrot.slane %v960_v38, %v2978_v40  ;;  %v975_v45 = vrot.slane %v2082_v39, %v2978_v40  ;;  %v983_v47 = vrot.slane %v976_v41, %v2978_v40  ;;  %v991_v48 = vrot.slane %v2083_v42, %v2978_v40 }
 0x393   : > { %v1360_v49 = vsel %vm1028_vm3, %v2378_v43, 0.0 }
 0x394   : > { %1361 = vadd.xlane.f32.xlu0 %v1360_v49  ;;  %v992_v50 = vcombine.low %v967_v44, %v975_v45  ;;  %v1008_v51 = vcombine.low %v983_v47, %v991_v48  ;;  %v993_v54 = vcombine.high %v967_v44, %v975_v45  ;;  %v1009_v55 = vcombine.high %v983_v47, %v991_v48 }
 0x396   : > { %v1000_v52 = vrot.slane %v992_v50, %v2980_v46  ;;  %v1016_v53 = vrot.slane %v1008_v51, %v2980_v46  ;;  %v1007_v58 = vrot.slane %v993_v54, %v2980_v46  ;;  %v1023_v59 = vrot.slane %v1009_v55, %v2980_v46 }
 0x398   : > { %v1024_v56 = vcombine.low %v1000_v52, %v1016_v53  ;;  %v1025_v57 = vcombine.high %v1000_v52, %v1016_v53  ;;  %v1026_v60 = vcombine.low %v1007_v58, %v1023_v59  ;;  %v1027_v9 = vcombine.high %v1007_v58, %v1023_v59 }
 0x39a   : > { %2197 = vmatpush3.msra.mxu1 %v1024_v56 }
 0x39b   : > { %2199 = vmatmul.mubr.msk.f32.vlgmr.msra.gmra.mrb[10].mxu1 %vm1028_vm3, %v2376_v32  ;;  %2201 = vmatprep.subr.mxu1 %v2634_v1 }
 0x39c   : > { %2202 = vmatpush3.msra.mxu1 %v1025_v57  ;;  %2203 = vmatprep.mubr.msk.f32.mxu1 %vm2633_vm0, %v2634_v1 }
 0x39d   : > { %2206 = vmatprep.subr.mxu1 %v2634_v1 }
 0x39f   : > { %2204 = vmatmul.mubr.msk.f32.vlgmr.msra.gmra.mrb[12].mxu1 %vm1028_vm3, %v2378_v43 }
 0x3a0   : > { %2207 = vmatpush3.msra.mxu1 %v1026_v60  ;;  %2208 = vmatprep.mubr.msk.f32.mxu1 %vm2633_vm0, %v2634_v1 }
 0x3a1   : > { %2211 = vmatprep.subr.mxu1 %v2634_v1 }
 0x3b4   : > { %v1341_v61 = vpop.xlane.xlu0 %1340 }
 0x3b5   : > { %v1347_v62 = vsub.f32 %v3036_v5, %v1341_v61 }
 0x3b7   : > { %v1353_v63 = vmul.f32 1.442695, %v1347_v62 }
 0x3b8   : > { %v1344_v2 = vpop.xlane.xlu0 %1343 }
 0x3b9   : > { %2379 = vpow2.f32 %v1353_v63  ;;  %v1348_v3 = vsub.f32 %v3038_v7, %v1344_v2  ;;  %v1822_v7 = vld [vmem:[#allocation12] sm:$0xff] }
 0x3ba   : > { %v2252_v13 = vpack.c.bf16 %v1823_v12, %v1822_v7 }
 0x3bb   : > { %v1355_v6 = vmul.f32 1.442695, %v1348_v3 }
 0x3bc   : > { %2254 = vmatpush3.bf16.xpose.msk.msra.mxu0 %vm2938_vm2, %v2252_v13 }
 0x3bd   : > { %2381 = vpow2.f32 %v1355_v6  ;;  %2255 = vmatprep.subr.bf16.mxu0 %v2632_v0 }
 0x3c3   : > { %v2380_v8 = vpop.eup %2379 }
 0x3c4   : > { %2209 = vmatmul.mubr.msk.f32.vlgmr.msra.gmra.mrb[14].mxu1 %vm1028_vm3, %v2380_v8  ;;  %v1363_v10 = vsel %vm1028_vm3, %v2380_v8, 0.0  ;;  %2258 = vmatpush3.bf16.xpose.msk.msra.mxu0 %vm2938_vm2, %v2256_v16 }
 0x3c5   : > { %2212 = vmatpush3.msra.mxu1 %v1027_v9  ;;  %1364 = vadd.xlane.f32.xlu0 %v1363_v10 }
 0x3c6   : > { %2213 = vmatprep.mubr.msk.f32.mxu1 %vm2633_vm0, %v2634_v1 }
 0x3c7   : > { %v2382_v11 = vpop.eup %2381 }
 0x3c8   : > { %2214 = vmatmul.mubr.msk.f32.vlgmr.msra.gmra.mrb[16].mxu1 %vm1028_vm3, %v2382_v11  ;;  %v1366_v5 = vsel %vm1028_vm3, %v2382_v11, 0.0 }
 0x3c9   : > { %1367 = vadd.xlane.f32.xlu1 %v1366_v5 }
 0x41d   : > { %v1359_v21 = vpop.xlane.xlu1 %1358 }
 0x41e   : > { %2383 = vrcp.f32 %v1359_v21 }
 0x421   : > { %v1362_v20 = vpop.xlane.xlu0 %1361 }
 0x428   : > { %v2384_v24 = vpop.eup %2383 }
 0x452   : > { %v1365_v22 = vpop.xlane.xlu0 %1364 }
 0x453   : > { %2385 = vrcp.f32 %v1365_v22 }
 0x454   : > { %2387 = vrcp.f32 %v1362_v20 }
 0x456   : > { %v1368_v23 = vpop.xlane.xlu1 %1367 }
 0x457   : > { %2389 = vrcp.f32 %v1368_v23 }
 0x45d   : > { %v2386_v0 = vpop.eup %2385 }
 0x45e   : > { %v2388_v4 = vpop.eup %2387 }
 0x461   : > { %v2390_v31 = vpop.eup %2389 }
 0x46e   : > { %v1438_v1 = vpop.f32.mrb[10].mxu1 }
 0x46f   : > { %v2200_v17 = vpop.f32.mrb[11].mxu1  ;;  %v1665_v26 = vmul.f32 %v2384_v24, %v1438_v1 }
 0x472   : > { %v1511_v18 = vpop.f32.mrb[12].mxu1 }
 0x473   : > { %v2205_v19 = vpop.f32.mrb[13].mxu1  ;;  %v1666_v36 = vmul.f32 %v2388_v4, %v1511_v18 }
 0x497   : > { %v1584_v25 = vpop.f32.mrb[14].mxu1 }
 0x498   : > { %v1667_v27 = vmul.f32 %v2386_v0, %v1584_v25  ;;  %v2210_v28 = vpop.f32.mrb[15].mxu1 }
 0x49a   : > { %v1669_v29 = vcombine.low %v1665_v26, %v1667_v27  ;;  %v1670_v30 = vcombine.high %v1665_v26, %v1667_v27 }
 0x49b   : > { %v1657_v32 = vpop.f32.mrb[16].mxu1 }
 0x49c   : > { %v1668_v33 = vmul.f32 %v2390_v31, %v1657_v32  ;;  %v2215_v34 = vpop.f32.mrb[17].mxu1  ;;  %v1677_v38 = vrot.slane %v1669_v29, %v2978_v40  ;;  %v1684_v39 = vrot.slane %v1670_v30, %v2978_v40 }
 0x49e   : > { %v1685_v35 = vcombine.low %v1666_v36, %v1668_v33  ;;  %v1686_v37 = vcombine.high %v1666_v36, %v1668_v33 }
 0x4a0   : > { %v1693_v41 = vrot.slane %v1685_v35, %v2978_v40  ;;  %v1700_v42 = vrot.slane %v1686_v37, %v2978_v40 }
 0x4a2   : > { %v1701_v43 = vcombine.low %v1677_v38, %v1693_v41  ;;  %v1702_v44 = vcombine.high %v1677_v38, %v1693_v41  ;;  %v1717_v45 = vcombine.low %v1684_v39, %v1700_v42  ;;  %v1718_v47 = vcombine.high %v1684_v39, %v1700_v42 }
 0x4a4   : > { %v1709_v48 = vrot.slane %v1701_v43, %v2980_v46  ;;  %v1716_v49 = vrot.slane %v1702_v44, %v2980_v46  ;;  %v1725_v50 = vrot.slane %v1717_v45, %v2980_v46  ;;  %v1732_v51 = vrot.slane %v1718_v47, %v2980_v46 }
 0x4a6   : > { %v1737_v52 = vcombine.low %v1709_v48, %v1716_v49  ;;  %v2096_v53 = vcombine.high %v1709_v48, %v1716_v49  ;;  %v1753_v54 = vcombine.low %v1725_v50, %v1732_v51  ;;  %v2097_v55 = vcombine.high %v1725_v50, %v1732_v51 }
 0x4a8   : > { %v1744_v56 = vrot.slane %v1737_v52, %v2978_v40  ;;  %v1752_v57 = vrot.slane %v2096_v53, %v2978_v40  ;;  %v1760_v58 = vrot.slane %v1753_v54, %v2978_v40  ;;  %v1768_v59 = vrot.slane %v2097_v55, %v2978_v40 }
 0x4aa   : > { %v1770_v60 = vcombine.high %v1744_v56, %v1752_v57  ;;  %v1786_v61 = vcombine.high %v1760_v58, %v1768_v59  ;;  %v1769_v62 = vcombine.low %v1744_v56, %v1752_v57  ;;  %v1785_v63 = vcombine.low %v1760_v58, %v1768_v59 }
 0x4ac   : > { %v1784_v2 = vrot.slane %v1770_v60, %v2980_v46  ;;  %v1800_v3 = vrot.slane %v1786_v61, %v2980_v46  ;;  %v1777_v6 = vrot.slane %v1769_v62, %v2980_v46  ;;  %v1793_v8 = vrot.slane %v1785_v63, %v2980_v46 }
 0x4ae   : > { %v1803_v9 = vcombine.low %v1784_v2, %v1800_v3  ;;  %v1802_v10 = vcombine.high %v1777_v6, %v1793_v8  ;;  %v1804_v11 = vcombine.high %v1784_v2, %v1800_v3  ;;  %v1801_v5 = vcombine.low %v1777_v6, %v1793_v8 }
 0x4b0   : > { %1810 = vrot.lane.b32.xlu1 %v1803_v9, %s2640_s8  ;;  %1806 = vrot.lane.b32.xlu0 %v1802_v10, %s2641_s7 }
 0x4b4   : > { %1814 = vrot.lane.b32.xlu1 %v1804_v11, %s2642_s29 }
 0x522   : > { %v1811_v40 = vpop.permute.xlu1 %1810  ;;  %v1807_v7 = vpop.permute.xlu0 %1806 }
 0x523   : > { %v1817_v12 = vsel %vm1028_vm3, %v1801_v5, %v1807_v7 }
 0x524   : > { %v1819_v13 = vsel %vm1818_vm4, %v1817_v12, %v1811_v40 }
 0x526   : > { %v1815_v46 = vpop.permute.xlu1 %1814 }
 0x527   : > { %v1821_v14 = vsel %vm1820_vm5, %v1819_v13, %v1815_v46 }
 0x528   : > { %2225 = vmatmul.mubr.msk.f32.vlgmr.msra.gmra.mrb[4].mxu0 %vm321_vm1, %v1821_v14 }
 0x5fb   : > { %v1907_v15 = vpop.f32.mrb[4].mxu0 }
 0x5fc   : > { %1911 = vst.msk [vmem:[%s311_s15] sm:$0xff] %vm321_vm1, %v1907_v15  ;;  %v2226_v16 = vpop.f32.mrb[5].mxu0 }
 0x5fd   : > { %2546 = shalt.err (!%p2543_p8)
}
 0x5fe   : > { %s2547_s27 = scalar_lea.hbm %s3114_s17, 128  ;;  %s2551_s7 = scalar_lea.hbm %s3169_s5, 256 }
 0x5ff   : > { %p2548_p3 = scmp.ne.s32.totalorder %s3114_s17, %s2547_s27  ;;  %p2552_p13 = scmp.lt.u32.totalorder %s3114_s17, %s3169_s5 }
 0x600   : > { %p2553_p12 = scmp.lt.u32.totalorder %s2551_s7, %s2547_s27  ;;  %p2555_p2 = scmp.lt.u32.totalorder %s2547_s27, %s3114_s17 }
 0x601   : > { %p2549_p11 = pnand %p2548_p3, %p3188_p9 }
 0x602   : > { %p2554_p4 = por %p2553_p12, %p2552_p13 }
 0x603   : > { %p2550_p6 = pneg %p2549_p11 }
 0x604   : > { %p2556_p10 = por %p2555_p2, %p2554_p4 }
 0x606   : > { %p2557_p1 = pnand %p2556_p10, %p2550_p6 }
 0x608   : > { %2560 = shalt.err (!%p2557_p1)
}
 0x609   : > { %2277 = dma.vmem_to_hbm [thread:$0]  (%p3188_p9), %s3116_s6, 128, %s3114_s17, %s1913_s28  }
 0x60a PF: > { %s1939_s15 = sand.u32 1, %s2603_s18   ;;  %p3189_p0 = scmp.ne.s32.totalorder %s3182_s13, 0 }
 0x60b   : > { %p3190_p7 = scmp.ge.s32.totalorder %s2623_s23, 2  ;;  %s1940_s24 = scalar_lea.sflag [#allocation6], %s1939_s15 }
 0x60d   : > { %p2297_p5 = pnand %p3190_p7, %p3189_p0 }
 0x60f   : > { %2598 = dma.done.wait (!%p2297_p5), %s1940_s24, 128  }
 0x610   : > { %2600 = vsyncadd (!%p2297_p5), %s1940_s24, 4294967168  ;;  %s23_s23 = sadd.s32 1, %s2623_s23   ;;  %s3191_s18 = smov %s2607_s19 }
 0x611   : > { %p20_p8 = scmp.ge.s32.totalorder %s23_s23, 4   ;;  %s3192_s19 = smov %s2611_s20 }
 0x612   : > { %s3193_s20 = smov %s2862_s12  ;;  %s3194_s21 = smov %s2619_s22 }
 0x613   : > { %s3195_s22 = smov %s3197_s14  ;;  %22 = sbr.rel (!%p20_p8) target bundleno = 8 (0x8), region = 106 }
 0x61a   :  { %1945 = vsyncpa [#allocation5], 1 }
 0x61b   :  { %1947 = vsyncpa [#allocation5 + $0x1], 1 }
 0x61c   :  { %1948 = vsyncpa [#allocation8], 1 }
 0x61d   :  { %1949 = vsyncpa [#allocation11], 1 }
 0x61e   :  { %1950 = vsyncpa [#allocation6], 1 }
 0x61f   :  { %1952 = vsyncpa [#allocation6 + $0x1], 1 }

</bundles_post_ra>
